<compile_context>
chip_gen: v6e
topology: v6e:2x2x1
jax: 0.10.0
libtpu: 0.0.40
codegen_flags: <defaults>
</compile_context>

<pallas_src>
import jax
import jax.numpy as jnp
from jax.experimental import pallas as pl
from jax.experimental.pallas import tpu as pltpu


def _cdiv(a: int, b: int) -> int:
    return -(-a // b)


def _star_relu_kernel(params_ref, x_ref, o_ref):
    # params_ref: f32[2] in SMEM = (scale, bias); x_ref/o_ref: VMEM tiles.
    x = x_ref[...]
    s = params_ref[0].astype(x.dtype)
    b = params_ref[1].astype(x.dtype)
    r = jnp.maximum(x, 0.0)
    o_ref[...] = (s * (r * r) + b).astype(o_ref.dtype)


def _vmem_capacity_bytes() -> int:
    try:
        info = pltpu.get_tpu_info()
        cap = getattr(info, "vmem_capacity_bytes", None)
        if cap:
            return int(cap)
    except Exception:
        pass
    return 64 * 1024 * 1024  # conservative (v7x-sized) fallback


def _launch(x_view, params, block_shape, index_map, vmem_limit):
    grid = (_cdiv(x_view.shape[0], block_shape[0]),)
    return pl.pallas_call(
        _star_relu_kernel,
        out_shape=jax.ShapeDtypeStruct(x_view.shape, x_view.dtype),
        grid_spec=pltpu.PrefetchScalarGridSpec(
            num_scalar_prefetch=0,
            grid=grid,
            in_specs=[
                pl.BlockSpec(memory_space=pltpu.MemorySpace.SMEM),  # (scale, bias)
                pl.BlockSpec(block_shape, index_map),
            ],
            out_specs=pl.BlockSpec(block_shape, index_map),
        ),
        compiler_params=pltpu.CompilerParams(
            dimension_semantics=("parallel",),
            vmem_limit_bytes=vmem_limit,
        ),
    )(params, x_view)


def star_relu(x: jnp.ndarray, scale, bias, *,
              max_block_bytes: int | None = None,
              min_pallas_bytes: int = 256 * 1024) -> jnp.ndarray:
    """StarReLU activation: scale * relu(x)**2 + bias (elementwise)."""
    orig_shape = x.shape
    dtype = x.dtype
    n = x.size
    if n == 0:
        return x

    scale = jnp.asarray(scale, jnp.float32).reshape(())
    bias = jnp.asarray(bias, jnp.float32).reshape(())
    itemsize = jnp.dtype(dtype).itemsize

    # Small-input fast path: pallas_call launch overhead dominates; let XLA fuse.
    if n * itemsize < min_pallas_bytes:
        r = jnp.maximum(x, 0.0)
        return (scale.astype(dtype) * (r * r) + bias.astype(dtype)).astype(dtype)

    params = jnp.stack([scale, bias])  # f32[2] -> SMEM operand

    # Per-generation VMEM budget (v5e/v6e: 128 MiB physical, v7x: 64 MiB).
    vmem_cap = _vmem_capacity_bytes()
    if vmem_cap >= 100 * 1024 * 1024:
        default_block_bytes, vmem_limit = 8 * 1024 * 1024, 64 * 1024 * 1024
    else:
        default_block_bytes, vmem_limit = 4 * 1024 * 1024, 48 * 1024 * 1024
    block_bytes = default_block_bytes if max_block_bytes is None else max_block_bytes

    sublane = max(8, 32 // itemsize)  # 8 (f32) / 16 (bf16,f16) / 32 (8-bit)

    # Widest lane-dense width (multiple of 128) that divides n exactly.
    width = next((c for c in (2048, 1024, 512, 256, 128) if n % c == 0), None)

    if width is not None:
        # ---------- 2-D lane-dense path (common case) ----------
        n_rows = n // width
        x_view = x.reshape(n_rows, width)          # metadata-only, no HBM pass
        row_bytes = width * itemsize
        if n_rows <= sublane:
            block_rows = n_rows                    # full-dim block (always legal)
        else:
            target_rows = max(sublane, block_bytes // row_bytes)
            # Megacore (v7x): keep >= 2 grid steps so both TensorCores engage.
            target_rows = min(target_rows, _cdiv(n_rows, 2))
            block_rows = min(n_rows, target_rows)
            block_rows = max(sublane, (block_rows // sublane) * sublane)
            # Prefer an even number of grid steps (balances the two TCs).
            g = _cdiv(n_rows, block_rows)
            if g > 1 and g % 2 == 1:
                alt = _cdiv(_cdiv(n_rows, g + 1), sublane) * sublane
                if alt >= sublane and _cdiv(n_rows, alt) % 2 == 0:
                    block_rows = alt
        out = _launch(x_view, params, (block_rows, width),
                      lambda i: (i, 0), vmem_limit)
    else:
        # ---------- 1-D ragged path: flat view, masked partial last block ----
        # (replaces the old jnp.pad + output-slice fallback: no extra HBM passes)
        x_view = x.reshape(-1)
        max_elems = max(1024, (block_bytes // itemsize) // 1024 * 1024)
        if n <= max_elems:
            if n >= 4096:
                block_elems = _cdiv(_cdiv(n, 2), 1024) * 1024  # 2 grid steps
                if block_elems >= n:
                    block_elems = n
            else:
                block_elems = n                    # single full-array block
        else:
            block_elems = max_elems
        out = _launch(x_view, params, (block_elems,),
                      lambda i: (i,), vmem_limit)

    return out.reshape(orig_shape)


def _reference(x, scale, bias):
    return scale * jnp.maximum(x, 0.0) ** 2 + bias


if __name__ == "__main__":
    # Mirrors StarReLU(scale_value=1.0, bias_value=0.0) default parameter init.
    key = jax.random.PRNGKey(0)
    k1, k2, k3 = jax.random.split(key, 3)

    # 1) Small NCHW demo tensor (batch=2, channels=4, 16x16). Force the Pallas
    #    path so the kernel itself is exercised despite the small-input fast path.
    x = jax.random.normal(k1, (2, 4, 16, 16), dtype=jnp.float32)
    out = jax.block_until_ready(star_relu(x, 1.0, 0.0, min_pallas_bytes=0))
    assert out.shape == x.shape and out.dtype == x.dtype
    assert jnp.allclose(out, _reference(x, 1.0, 0.0), atol=1e-5, rtol=1e-6)

    # 2) Larger 128-aligned tensor: 2-D lane-dense path, multi-step even grid,
    #    non-default (learnable-style) scale/bias through the SMEM operand.
    x2 = jax.random.normal(k2, (4, 32, 32, 32), dtype=jnp.float32)
    out2 = jax.block_until_ready(star_relu(x2, 1.5, -0.25))
    assert jnp.allclose(out2, _reference(x2, 1.5, -0.25), atol=1e-5, rtol=1e-6)

    # 3) Ragged size (not a multiple of 128): 1-D path with masked partial
    #    last block — no pad / slice passes.
    x3 = jax.random.normal(k3, (5, 123, 131), dtype=jnp.float32)
    out3 = jax.block_until_ready(star_relu(x3, 0.8944, 0.4472))
    assert out3.shape == x3.shape and out3.dtype == x3.dtype
    assert jnp.allclose(out3, _reference(x3, 0.8944, 0.4472), atol=1e-5, rtol=1e-6)

    # 4) Small-input fast path (default threshold, no Pallas launch).
    out4 = jax.block_until_ready(star_relu(x, 2.0, 0.5))
    assert jnp.allclose(out4, _reference(x, 2.0, 0.5), atol=1e-5, rtol=1e-6)

    print("KERNEL_OK")
</pallas_src>

<mosaic_0001>
module attributes {stable_mosaic.version = 11 : i64} {
  func.func @_star_relu_kernel(%arg0: i32, %arg1: memref<2xf32, #tpu.memory_space<smem>>, %arg2: memref<1x2048xf32, #tpu.memory_space<vmem>>, %arg3: memref<1x2048xf32, #tpu.memory_space<vmem>>) attributes {dimension_semantics = [#tpu.dimension_semantics<parallel>], iteration_bounds = array<i64: 1>, scalar_prefetch = 0 : i64, scratch_operands = 0 : i64, tpu.core_type = #tpu.core_type<tc>, window_params = [{transform_indices = @transform_0, window_bounds = array<i64: 2>}, {transform_indices = @transform_1, window_bounds = array<i64: 1, 2048>}, {transform_indices = @transform_2, window_bounds = array<i64: 1, 2048>}]} {
    %c0 = arith.constant 0 : index
    %c0_0 = arith.constant 0 : index
    %0 = vector.load %arg2[%c0, %c0_0] : memref<1x2048xf32, #tpu.memory_space<vmem>>, vector<1x2048xf32>
    %c0_1 = arith.constant 0 : index
    %1 = memref.load %arg1[%c0_1] : memref<2xf32, #tpu.memory_space<smem>>
    %c1 = arith.constant 1 : index
    %2 = memref.load %arg1[%c1] : memref<2xf32, #tpu.memory_space<smem>>
    %cst = arith.constant 0.000000e+00 : f32
    %3 = vector.broadcast %cst : f32 to vector<1x2048xf32>
    %4 = arith.maximumf %0, %3 : vector<1x2048xf32>
    %5 = arith.mulf %4, %4 : vector<1x2048xf32>
    %6 = vector.broadcast %1 : f32 to vector<1x2048xf32>
    %7 = arith.mulf %6, %5 : vector<1x2048xf32>
    %8 = vector.broadcast %2 : f32 to vector<1x2048xf32>
    %9 = arith.addf %7, %8 : vector<1x2048xf32>
    %c0_2 = arith.constant 0 : index
    %c0_3 = arith.constant 0 : index
    %10 = vector.load %arg3[%c0_2, %c0_3] : memref<1x2048xf32, #tpu.memory_space<vmem>>, vector<1x2048xf32>
    tpu.vector_store %arg3[%c0_2, %c0_3], %9 {strides = array<i32>} : memref<1x2048xf32, #tpu.memory_space<vmem>>, vector<1x2048xf32>,
    return
  }
  func.func @transform_0(%arg0: i32) -> i32 {
    %c0_i32 = arith.constant 0 : i32
    %c0_i32_0 = arith.constant 0 : i32
    return %c0_i32 : i32
  }
  func.func @transform_1(%arg0: i32) -> (i32, i32) {
    %c0_i32 = arith.constant 0 : i32
    %c0_i32_0 = arith.constant 0 : i32
    return %arg0, %c0_i32 : i32, i32
  }
  func.func @transform_2(%arg0: i32) -> (i32, i32) {
    %c0_i32 = arith.constant 0 : i32
    %c0_i32_0 = arith.constant 0 : i32
    return %arg0, %c0_i32 : i32, i32
  }
}

</mosaic_0001>

<bundles_post_ra>
// kernel: tpu_custom_call.1
= control target key start
LH: loop header
LB: loop body
LE: loop exit
PB: predicated region body
PF: predicated region fallthrough
CT: control target
= control target key end

     0   :  { %7 = vsyncpa [#allocation5], 0  ;;  %s152_s0 = inlined_call_operand.hbm [shape: f32[2], index: 0, kind: input, shape index: {}]   ;;  %s153_s1 = inlined_call_operand.hbm [shape: f32[1,2048], index: 1, kind: input, shape index: {}]   ;;  %s154_s2 = inlined_call_operand.hbm [shape: f32[1,2048], index: 2, kind: output, shape index: {}]  }
   0x1   :  { %8 = vsyncpa [#allocation3], 0 }
   0x2   :  { %9 = vsyncpa [#allocation4], 0  ;;  %s125_s9 = smov [#allocation2]   ;;  %s126_s12 = smov [#allocation6]  }
   0x3   :  { %17 = dma.hbm_to_smem %s152_s0, 16, %s125_s9, [#allocation5]  }
   0x4   :  { %s24_s13 = sshll.u32 %s126_s12, 4  ;;  %s25_s13 = int_to_ptr.vmem [resolvable:$true] %s24_s13 }
   0x5   :  { %s87_s14 = scalar_lea.vmem %s25_s13, 256  ;;  %p92_p1 = scmp.lt.s32.totalorder %s25_s13, %s25_s13 }
   0x6   :  { %p88_p0 = scmp.ne.s32.totalorder %s25_s13, %s87_s14  ;;  %p93_p2 = scmp.lt.s32.totalorder %s87_s14, %s87_s14 }
   0x8   :  { %p94_p3 = por %p93_p2, %p92_p1 }
   0xa   :  { %p95_p4 = pnand %p94_p3, %p88_p0 }
   0xc   :  { %98 = shalt.err (!%p95_p4)
}
   0xd   :  { %27 = dma.hbm_to_vmem [thread:$0]  %s153_s1, 256, %s25_s13, [#allocation3]  }
   0xe   :  { %119 = dma.done.wait [#allocation5], 16  }
   0xf   :  { %120 = vsyncadd [#allocation5], 4294967280 }
  0x10   :  { %121 = dma.done.wait [#allocation3], 256  }
  0x11   :  { %122 = vsyncadd [#allocation3], 4294967040 }
  0x12   :  { %34 = sfence }
  0x13   :  { %v35_v0 = vld [vmem:[#allocation6] sm:$0xff]  ;;  %s37_s0 = sld [smem:[#allocation2]]  ;;  %v36_v1 = vld [vmem:[#allocation6 + $0x8] sm:$0xff]  ;;  %s127_s18 = smov [#allocation7]  }
  0x14   :  { %s67_s17 = sld [smem:[#allocation2 + $0x1]]  ;;  %v39_v2 = vmax.f32 %v35_v0, 0.0  ;;  %v40_v3 = vmax.f32 %v36_v1, 0.0  ;;  %s57_s19 = sshll.u32 %s127_s18, 4  ;;  %s58_s19 = int_to_ptr.vmem [resolvable:$true] %s57_s19 }
  0x15   :  { %s99_s1 = scalar_lea.vmem %s58_s19, 256  ;;  %p104_p6 = scmp.lt.s32.totalorder %s58_s19, %s58_s19 }
  0x16   :  { %v41_v4 = vmul.f32 %v39_v2, %v39_v2  ;;  %v42_v5 = vmul.f32 %v40_v3, %v40_v3  ;;  %p100_p5 = scmp.ne.s32.totalorder %s58_s19, %s99_s1  ;;  %p105_p7 = scmp.lt.s32.totalorder %s99_s1, %s99_s1 }
  0x18   :  { %p106_p8 = por %p105_p7, %p104_p6 }
  0x19   :  { %v43_v6 = vstv %s37_s0 }
  0x1a   :  { %v44_v7 = vmul.f32 %v43_v6, %v41_v4  ;;  %v46_v8 = vstv %s67_s17  ;;  %v45_v9 = vmul.f32 %v43_v6, %v42_v5  ;;  %p107_p9 = pnand %p106_p8, %p100_p5 }
  0x1c   :  { %v47_v10 = vadd.f32 %v46_v8, %v44_v7  ;;  %v48_v11 = vadd.f32 %v46_v8, %v45_v9 }
  0x1e   :  { %49 = vst [vmem:[#allocation7] sm:$0xff] %v47_v10  ;;  %50 = vst [vmem:[#allocation7 + $0x8] sm:$0xff] %v48_v11 }
  0x1f   :  { %110 = shalt.err (!%p107_p9)
}
  0x20   :  { %60 = dma.vmem_to_hbm [thread:$0]  %s58_s19, 256, %s154_s2, [#allocation4]  }
  0x21   :  { %123 = dma.done.wait [#allocation4], 256  }
  0x22   :  { %124 = vsyncadd [#allocation4], 4294967040 }
  0x23   :  { %64 = vsyncpa [#allocation3], 1 }
  0x24   :  { %65 = vsyncpa [#allocation4], 1 }
  0x25   :  { %66 = vsyncpa [#allocation5], 1 }

</bundles_post_ra>
